<compile_context>
chip_gen: v7x
topology: tpu7x:2x2x1
jax: 0.10.0
libtpu: 0.0.40
codegen_flags: <defaults>
</compile_context>

<pallas_src>
import functools

import jax
import jax.numpy as jnp
from jax import lax
from jax.experimental import pallas as pl
from jax.experimental.pallas import tpu as pltpu


_EPS2 = 1e-24  # (1e-12)**2 ; F.normalize: x / max(||x||_2, 1e-12)


def _rownorm_scale(x):
    """1 / max(||x||_2, eps) per row, via a single rsqrt (EUP) + VPU ops."""
    sumsq = jnp.sum(x * x, axis=-1, keepdims=True)
    return lax.rsqrt(jnp.maximum(sumsq, jnp.float32(_EPS2)))


def _simclr_kernel(p_col_ref, p_row_ref, z_row_ref, loss_ref,
                   zn_scr, m_scr, l_scr, d_scr, *, inv_temp):
    j = pl.program_id(1)

    # ---- first column step: init running stats, diag term, cached z rows ----
    @pl.when(j == 0)
    def _():
        m_scr[...] = jnp.full_like(m_scr, -jnp.inf)
        l_scr[...] = jnp.zeros_like(l_scr)
        zr = z_row_ref[...].astype(jnp.float32)
        pr = p_row_ref[...].astype(jnp.float32)
        zr_n = zr * _rownorm_scale(zr)
        pr_n = pr * _rownorm_scale(pr)
        # logits[i, i] = (z_n[i] . p_n[i]) / T   (rowwise dot, O(TM*D))
        d_scr[...] = jnp.sum(zr_n * pr_n, axis=-1, keepdims=True) * inv_temp
        # Normalized z rows with 1/T folded in, reused for every column step.
        zn_scr[...] = zr_n * jnp.float32(inv_temp)

    # ---- logits block (TM, TN): NT contraction, no explicit transpose -------
    p = p_col_ref[...].astype(jnp.float32)
    p_n = p * _rownorm_scale(p)
    s = lax.dot_general(zn_scr[...], p_n, (((1,), (1,)), ((), ())),
                        preferred_element_type=jnp.float32)   # (TM, TN)

    # ---- online logsumexp update --------------------------------------------
    m_prev = m_scr[...]
    m_new = jnp.maximum(m_prev, jnp.max(s, axis=-1, keepdims=True))
    alpha = jnp.exp(m_prev - m_new)
    l_scr[...] = alpha * l_scr[...] + jnp.sum(jnp.exp(s - m_new),
                                              axis=-1, keepdims=True)
    m_scr[...] = m_new

    # ---- last column step: per-row loss = lse - diag -------------------------
    @pl.when(j == pl.num_programs(1) - 1)
    def _():
        lse = m_scr[...] + jnp.log(l_scr[...])
        loss_ref[...] = lse - d_scr[...]


def _pick_tile(n, preferred=(512, 256, 128)):
    for t in preferred:
        if n >= t and n % t == 0:
            return t
    return n


def simclr_loss(z1, z2, temperature=0.5):
    """SimCLRLoss.forward(z1, z2) -> scalar loss (single-device gather/rank)."""
    # TODO(synk): torch.distributed gather()/get_rank() have no single-kernel
    # equivalent here; single-process semantics (gather = identity, rank = 0).
    n, d = z1.shape
    z1 = z1.astype(jnp.float32)
    z2 = z2.astype(jnp.float32)

    # Zero-pad feature dim to a lane-dense multiple of 128 (does not change
    # row norms or dot products).
    d_pad = ((d + 127) // 128) * 128
    if d_pad != d:
        pad = ((0, 0), (0, d_pad - d))
        z1 = jnp.pad(z1, pad)
        z2 = jnp.pad(z2, pad)
        d = d_pad

    tm = _pick_tile(n)
    tn = _pick_tile(n)
    grid = (n // tm, n // tn)   # reduction (column) axis last

    kernel = functools.partial(_simclr_kernel,
                               inv_temp=1.0 / float(temperature))

    per_row = pl.pallas_call(
        kernel,
        grid=grid,
        in_specs=[
            pl.BlockSpec((tn, d), lambda i, j: (j, 0)),   # p (z1) column block
            pl.BlockSpec((tm, d), lambda i, j: (i, 0)),   # p (z1) row block (diag)
            pl.BlockSpec((tm, d), lambda i, j: (i, 0)),   # z (z2) row block
        ],
        out_specs=pl.BlockSpec((tm, 1), lambda i, j: (i, 0)),
        out_shape=jax.ShapeDtypeStruct((n, 1), jnp.float32),
        scratch_shapes=[
            pltpu.VMEM((tm, d), jnp.float32),   # cached z_n / T rows
            pltpu.VMEM((tm, 1), jnp.float32),   # running row max m
            pltpu.VMEM((tm, 1), jnp.float32),   # running row sum l
            pltpu.VMEM((tm, 1), jnp.float32),   # diagonal term
        ],
        compiler_params=pltpu.CompilerParams(
            dimension_semantics=("parallel", "arbitrary")),
    )(z1, z1, z2)

    return jnp.sum(per_row) / jnp.float32(n)


def _reference_loss(z1, z2, temperature=0.5):
    """Pure-JAX reference of the PyTorch forward (single device)."""
    p = z1 / jnp.maximum(jnp.linalg.norm(z1, axis=-1, keepdims=True), 1e-12)
    z = z2 / jnp.maximum(jnp.linalg.norm(z2, axis=-1, keepdims=True), 1e-12)
    logits = (z @ p.T) / temperature
    lse = jax.scipy.special.logsumexp(logits, axis=-1)
    diag = jnp.diag(logits)
    return jnp.mean(lse - diag)


if __name__ == "__main__":
    key = jax.random.PRNGKey(0)
    k1, k2 = jax.random.split(key)
    N, D = 8, 32  # batch of 8 embeddings, hidden dim 32
    z1 = jax.random.normal(k1, (N, D), dtype=jnp.float32)
    z2 = jax.random.normal(k2, (N, D), dtype=jnp.float32)

    loss = simclr_loss(z1, z2, temperature=0.5)
    loss = jax.block_until_ready(loss)

    ref = _reference_loss(z1, z2, temperature=0.5)
    assert jnp.allclose(loss, ref, atol=1e-5, rtol=1e-5), (loss, ref)

    print("KERNEL_OK")
</pallas_src>

<mosaic_0001>
module attributes {stable_mosaic.version = 11 : i64} {
  func.func @_simclr_kernel(%arg0: i32, %arg1: i32, %arg2: memref<8x128xf32, #tpu.memory_space<vmem>>, %arg3: memref<8x128xf32, #tpu.memory_space<vmem>>, %arg4: memref<8x128xf32, #tpu.memory_space<vmem>>, %arg5: memref<8x1xf32, #tpu.memory_space<vmem>>, %arg6: memref<8x128xf32, #tpu.memory_space<vmem>>, %arg7: memref<8x1xf32, #tpu.memory_space<vmem>>, %arg8: memref<8x1xf32, #tpu.memory_space<vmem>>, %arg9: memref<8x1xf32, #tpu.memory_space<vmem>>) attributes {dimension_semantics = [#tpu.dimension_semantics<parallel>, #tpu.dimension_semantics<arbitrary>], iteration_bounds = array<i64: 1, 1>, scalar_prefetch = 0 : i64, scratch_operands = 4 : i64, tpu.core_type = #tpu.core_type<tc>, window_params = [{transform_indices = @transform_0, window_bounds = array<i64: 8, 128>}, {transform_indices = @transform_1, window_bounds = array<i64: 8, 128>}, {transform_indices = @transform_2, window_bounds = array<i64: 8, 128>}, {transform_indices = @transform_3, window_bounds = array<i64: 8, 1>}]} {
    %c0_i32 = arith.constant 0 : i32
    %0 = arith.cmpi eq, %arg1, %c0_i32 : i32
    %1 = arith.extui %0 : i1 to i32
    %c0_i32_0 = arith.constant 0 : i32
    %2 = arith.cmpi ne, %1, %c0_i32_0 : i32
    scf.if %2 {
      %cst_18 = arith.constant 0xFF800000 : f32
      %33 = vector.broadcast %cst_18 : f32 to vector<8x1xf32>
      %c0_19 = arith.constant 0 : index
      %c0_20 = arith.constant 0 : index
      %34 = vector.load %arg7[%c0_19, %c0_20] : memref<8x1xf32, #tpu.memory_space<vmem>>, vector<8x1xf32>
      tpu.vector_store %arg7[%c0_19, %c0_20], %33 {strides = array<i32>} : memref<8x1xf32, #tpu.memory_space<vmem>>, vector<8x1xf32>,
      %cst_21 = arith.constant 0.000000e+00 : f32
      %35 = vector.broadcast %cst_21 : f32 to vector<8x1xf32>
      %c0_22 = arith.constant 0 : index
      %c0_23 = arith.constant 0 : index
      %36 = vector.load %arg8[%c0_22, %c0_23] : memref<8x1xf32, #tpu.memory_space<vmem>>, vector<8x1xf32>
      tpu.vector_store %arg8[%c0_22, %c0_23], %35 {strides = array<i32>} : memref<8x1xf32, #tpu.memory_space<vmem>>, vector<8x1xf32>,
      %c0_24 = arith.constant 0 : index
      %c0_25 = arith.constant 0 : index
      %37 = vector.load %arg4[%c0_24, %c0_25] : memref<8x128xf32, #tpu.memory_space<vmem>>, vector<8x128xf32>
      %c0_26 = arith.constant 0 : index
      %c0_27 = arith.constant 0 : index
      %38 = vector.load %arg3[%c0_26, %c0_27] : memref<8x128xf32, #tpu.memory_space<vmem>>, vector<8x128xf32>
      %39 = arith.mulf %37, %37 : vector<8x128xf32>
      %cst_28 = arith.constant dense<0.000000e+00> : vector<8xf32>
      %40 = vector.multi_reduction <add>, %39, %cst_28 [1] : vector<8x128xf32> to vector<8xf32>
      %41 = vector.shape_cast %40 : vector<8xf32> to vector<8x1xf32>
      %cst_29 = arith.constant 1.000000e-24 : f32
      %42 = vector.broadcast %cst_29 : f32 to vector<8x1xf32>
      %43 = arith.maximumf %41, %42 : vector<8x1xf32>
      %44 = math.rsqrt %43 : vector<8x1xf32>
      %45 = vector.broadcast %44 : vector<8x1xf32> to vector<8x128xf32>
      %46 = arith.mulf %37, %45 : vector<8x128xf32>
      %47 = arith.mulf %38, %38 : vector<8x128xf32>
      %cst_30 = arith.constant dense<0.000000e+00> : vector<8xf32>
      %48 = vector.multi_reduction <add>, %47, %cst_30 [1] : vector<8x128xf32> to vector<8xf32>
      %49 = vector.shape_cast %48 : vector<8xf32> to vector<8x1xf32>
      %cst_31 = arith.constant 1.000000e-24 : f32
      %50 = vector.broadcast %cst_31 : f32 to vector<8x1xf32>
      %51 = arith.maximumf %49, %50 : vector<8x1xf32>
      %52 = math.rsqrt %51 : vector<8x1xf32>
      %53 = vector.broadcast %52 : vector<8x1xf32> to vector<8x128xf32>
      %54 = arith.mulf %38, %53 : vector<8x128xf32>
      %55 = arith.mulf %46, %54 : vector<8x128xf32>
      %cst_32 = arith.constant dense<0.000000e+00> : vector<8xf32>
      %56 = vector.multi_reduction <add>, %55, %cst_32 [1] : vector<8x128xf32> to vector<8xf32>
      %57 = vector.shape_cast %56 : vector<8xf32> to vector<8x1xf32>
      %cst_33 = arith.constant 2.000000e+00 : f32
      %58 = vector.broadcast %cst_33 : f32 to vector<8x1xf32>
      %59 = arith.mulf %57, %58 : vector<8x1xf32>
      %c0_34 = arith.constant 0 : index
      %c0_35 = arith.constant 0 : index
      %60 = vector.load %arg9[%c0_34, %c0_35] : memref<8x1xf32, #tpu.memory_space<vmem>>, vector<8x1xf32>
      tpu.vector_store %arg9[%c0_34, %c0_35], %59 {strides = array<i32>} : memref<8x1xf32, #tpu.memory_space<vmem>>, vector<8x1xf32>,
      %cst_36 = arith.constant 2.000000e+00 : f32
      %61 = vector.broadcast %cst_36 : f32 to vector<8x128xf32>
      %62 = arith.mulf %46, %61 : vector<8x128xf32>
      %c0_37 = arith.constant 0 : index
      %c0_38 = arith.constant 0 : index
      %63 = vector.load %arg6[%c0_37, %c0_38] : memref<8x128xf32, #tpu.memory_space<vmem>>, vector<8x128xf32>
      tpu.vector_store %arg6[%c0_37, %c0_38], %62 {strides = array<i32>} : memref<8x128xf32, #tpu.memory_space<vmem>>, vector<8x128xf32>,
    } else {
    }
    %c0 = arith.constant 0 : index
    %c0_1 = arith.constant 0 : index
    %3 = vector.load %arg2[%c0, %c0_1] : memref<8x128xf32, #tpu.memory_space<vmem>>, vector<8x128xf32>
    %4 = arith.mulf %3, %3 : vector<8x128xf32>
    %cst = arith.constant dense<0.000000e+00> : vector<8xf32>
    %5 = vector.multi_reduction <add>, %4, %cst [1] : vector<8x128xf32> to vector<8xf32>
    %6 = vector.shape_cast %5 : vector<8xf32> to vector<8x1xf32>
    %cst_2 = arith.constant 1.000000e-24 : f32
    %7 = vector.broadcast %cst_2 : f32 to vector<8x1xf32>
    %8 = arith.maximumf %6, %7 : vector<8x1xf32>
    %9 = math.rsqrt %8 : vector<8x1xf32>
    %10 = vector.broadcast %9 : vector<8x1xf32> to vector<8x128xf32>
    %11 = arith.mulf %3, %10 : vector<8x128xf32>
    %c0_3 = arith.constant 0 : index
    %c0_4 = arith.constant 0 : index
    %12 = vector.load %arg6[%c0_3, %c0_4] : memref<8x128xf32, #tpu.memory_space<vmem>>, vector<8x128xf32>
    %cst_5 = arith.constant dense<0.000000e+00> : vector<8x8xf32>
    %13 = tpu.matmul %12, %11, %cst_5 {dimension_numbers = #tpu.dot_dimension_numbers<[1], [1], [0], [0], [0, 0, 1, 0], [], []>} : vector<8x128xf32>, vector<8x128xf32>, vector<8x8xf32> -> vector<8x8xf32>
    %c0_6 = arith.constant 0 : index
    %c0_7 = arith.constant 0 : index
    %14 = vector.load %arg7[%c0_6, %c0_7] : memref<8x1xf32, #tpu.memory_space<vmem>>, vector<8x1xf32>
    %cst_8 = arith.constant dense<0xFF800000> : vector<8xf32>
    %15 = vector.multi_reduction <maximumf>, %13, %cst_8 [1] : vector<8x8xf32> to vector<8xf32>
    %16 = vector.shape_cast %15 : vector<8xf32> to vector<8x1xf32>
    %17 = arith.maximumf %14, %16 : vector<8x1xf32>
    %18 = arith.subf %14, %17 : vector<8x1xf32>
    %19 = math.exp %18 : vector<8x1xf32>
    %c0_9 = arith.constant 0 : index
    %c0_10 = arith.constant 0 : index
    %20 = vector.load %arg8[%c0_9, %c0_10] : memref<8x1xf32, #tpu.memory_space<vmem>>, vector<8x1xf32>
    %21 = arith.mulf %19, %20 : vector<8x1xf32>
    %22 = vector.broadcast %17 : vector<8x1xf32> to vector<8x8xf32>
    %23 = arith.subf %13, %22 : vector<8x8xf32>
    %24 = math.exp %23 : vector<8x8xf32>
    %cst_11 = arith.constant dense<0.000000e+00> : vector<8xf32>
    %25 = vector.multi_reduction <add>, %24, %cst_11 [1] : vector<8x8xf32> to vector<8xf32>
    %26 = vector.shape_cast %25 : vector<8xf32> to vector<8x1xf32>
    %27 = arith.addf %21, %26 : vector<8x1xf32>
    %c0_12 = arith.constant 0 : index
    %c0_13 = arith.constant 0 : index
    %28 = vector.load %arg8[%c0_12, %c0_13] : memref<8x1xf32, #tpu.memory_space<vmem>>, vector<8x1xf32>
    tpu.vector_store %arg8[%c0_12, %c0_13], %27 {strides = array<i32>} : memref<8x1xf32, #tpu.memory_space<vmem>>, vector<8x1xf32>,
    %c0_14 = arith.constant 0 : index
    %c0_15 = arith.constant 0 : index
    %29 = vector.load %arg7[%c0_14, %c0_15] : memref<8x1xf32, #tpu.memory_space<vmem>>, vector<8x1xf32>
    tpu.vector_store %arg7[%c0_14, %c0_15], %17 {strides = array<i32>} : memref<8x1xf32, #tpu.memory_space<vmem>>, vector<8x1xf32>,
    %c0_i32_16 = arith.constant 0 : i32
    %30 = arith.cmpi eq, %arg1, %c0_i32_16 : i32
    %31 = arith.extui %30 : i1 to i32
    %c0_i32_17 = arith.constant 0 : i32
    %32 = arith.cmpi ne, %31, %c0_i32_17 : i32
    scf.if %32 {
      %c0_18 = arith.constant 0 : index
      %c0_19 = arith.constant 0 : index
      %33 = vector.load %arg7[%c0_18, %c0_19] : memref<8x1xf32, #tpu.memory_space<vmem>>, vector<8x1xf32>
      %c0_20 = arith.constant 0 : index
      %c0_21 = arith.constant 0 : index
      %34 = vector.load %arg8[%c0_20, %c0_21] : memref<8x1xf32, #tpu.memory_space<vmem>>, vector<8x1xf32>
      %35 = math.log %34 : vector<8x1xf32>
      %36 = arith.addf %33, %35 : vector<8x1xf32>
      %c0_22 = arith.constant 0 : index
      %c0_23 = arith.constant 0 : index
      %37 = vector.load %arg9[%c0_22, %c0_23] : memref<8x1xf32, #tpu.memory_space<vmem>>, vector<8x1xf32>
      %38 = arith.subf %36, %37 : vector<8x1xf32>
      %c0_24 = arith.constant 0 : index
      %c0_25 = arith.constant 0 : index
      %39 = vector.load %arg5[%c0_24, %c0_25] : memref<8x1xf32, #tpu.memory_space<vmem>>, vector<8x1xf32>
      tpu.vector_store %arg5[%c0_24, %c0_25], %38 {strides = array<i32>} : memref<8x1xf32, #tpu.memory_space<vmem>>, vector<8x1xf32>,
    } else {
    }
    return
  }
  func.func @transform_0(%arg0: i32, %arg1: i32) -> (i32, i32) {
    %c0_i32 = arith.constant 0 : i32
    %c0_i32_0 = arith.constant 0 : i32
    return %arg1, %c0_i32 : i32, i32
  }
  func.func @transform_1(%arg0: i32, %arg1: i32) -> (i32, i32) {
    %c0_i32 = arith.constant 0 : i32
    %c0_i32_0 = arith.constant 0 : i32
    return %arg0, %c0_i32 : i32, i32
  }
  func.func @transform_2(%arg0: i32, %arg1: i32) -> (i32, i32) {
    %c0_i32 = arith.constant 0 : i32
    %c0_i32_0 = arith.constant 0 : i32
    return %arg0, %c0_i32 : i32, i32
  }
  func.func @transform_3(%arg0: i32, %arg1: i32) -> (i32, i32) {
    %c0_i32 = arith.constant 0 : i32
    %c0_i32_0 = arith.constant 0 : i32
    return %arg0, %c0_i32 : i32, i32
  }
}

</mosaic_0001>

<bundles_post_ra>
// kernel: tpu_custom_call.1
= control target key start
LH: loop header
LB: loop body
LE: loop exit
PB: predicated region body
PF: predicated region fallthrough
CT: control target
= control target key end

     0   :  { %8 = vsyncpa [#allocation7], 0  ;;  %s370_s0 = inlined_call_operand.hbm [shape: f32[8,128], index: 0, kind: input, shape index: {}]   ;;  %s371_s1 = inlined_call_operand.hbm [shape: f32[8,128], index: 1, kind: input, shape index: {}]   ;;  %s372_s2 = inlined_call_operand.hbm [shape: f32[8,128], index: 2, kind: input, shape index: {}]   ;;  %s373_s3 = inlined_call_operand.vmem [shape: f32[8,1], index: 3, kind: output, shape index: {}]  }
   0x1   :  { %9 = vsyncpa [#allocation9], 0  ;;  %s296_s12 = smov [#allocation8]   ;;  %s297_s14 = smov [#allocation6]  }
   0x2   :  { %s26_s13 = sshll.u32 %s296_s12, 4  ;;  %s16_s15 = sshll.u32 %s297_s14, 4  ;;  %s27_s13 = int_to_ptr.vmem [resolvable:$true] %s26_s13  ;;  %s17_s15 = int_to_ptr.vmem [resolvable:$true] %s16_s15 }
   0x3   :  { %s226_s18 = scalar_lea.hbm %s371_s1, 128 }
   0x4   :  { %p227_p0 = scmp.ne.s32.totalorder %s371_s1, %s226_s18  ;;  %p230_p1 = scmp.lt.u32.totalorder %s226_s18, %s371_s1 }
   0x6   :  { %p232_p2 = pnand %p230_p1, %p227_p0 }
   0x8   :  { %235 = shalt.err (!%p232_p2)
}
   0x9   :  { %s236_s23 = scalar_lea.vmem %s27_s13, 128  ;;  %p241_p4 = scmp.lt.s32.totalorder %s27_s13, %s27_s13 }
   0xa   :  { %p237_p3 = scmp.ne.s32.totalorder %s27_s13, %s236_s23  ;;  %p242_p5 = scmp.lt.s32.totalorder %s236_s23, %s236_s23 }
   0xc   :  { %p243_p6 = por %p242_p5, %p241_p4 }
   0xe   :  { %p244_p7 = pnand %p243_p6, %p237_p3 }
  0x10   :  { %247 = shalt.err (!%p244_p7)
}
  0x11   :  { %29 = dma.hbm_to_vmem [thread:$0]  %s371_s1, 128, %s27_s13, [#allocation9]  }
  0x12   :  { %s248_s28 = scalar_lea.hbm %s370_s0, 128 }
  0x13   :  { %p249_p8 = scmp.ne.s32.totalorder %s370_s0, %s248_s28  ;;  %p252_p9 = scmp.lt.u32.totalorder %s248_s28, %s370_s0 }
  0x15   :  { %p254_p10 = pnand %p252_p9, %p249_p8 }
  0x17   :  { %257 = shalt.err (!%p254_p10)
}
  0x18   :  { %s258_s6 = scalar_lea.vmem %s17_s15, 128  ;;  %p263_p12 = scmp.lt.s32.totalorder %s17_s15, %s17_s15 }
  0x19   :  { %p259_p11 = scmp.ne.s32.totalorder %s17_s15, %s258_s6  ;;  %p264_p13 = scmp.lt.s32.totalorder %s258_s6, %s258_s6 }
  0x1b   :  { %p265_p0 = por %p264_p13, %p263_p12 }
  0x1d   :  { %p266_p1 = pnand %p265_p0, %p259_p11 }
  0x1f   :  { %269 = shalt.err (!%p266_p1)
}
  0x20   :  { %19 = dma.hbm_to_vmem [thread:$0]  %s370_s0, 128, %s17_s15, [#allocation7]  }
  0x21   :  { %s298_s8 = smov [#allocation10]   ;;  %s270_s12 = scalar_lea.hbm %s372_s2, 128 }
  0x22   :  { %s36_s9 = sshll.u32 %s298_s8, 4  ;;  %p271_p2 = scmp.ne.s32.totalorder %s372_s2, %s270_s12  ;;  %s37_s9 = int_to_ptr.vmem [resolvable:$true] %s36_s9 }
  0x23   :  { %p274_p3 = scmp.lt.u32.totalorder %s270_s12, %s372_s2 }
  0x25   :  { %p276_p4 = pnand %p274_p3, %p271_p2 }
  0x27   :  { %279 = shalt.err (!%p276_p4)
}
  0x28   :  { %s280_s18 = scalar_lea.vmem %s37_s9, 128  ;;  %p285_p6 = scmp.lt.s32.totalorder %s37_s9, %s37_s9 }
  0x29   :  { %p281_p5 = scmp.ne.s32.totalorder %s37_s9, %s280_s18  ;;  %p286_p7 = scmp.lt.s32.totalorder %s280_s18, %s280_s18 }
  0x2b   :  { %p287_p8 = por %p286_p7, %p285_p6 }
  0x2d   :  { %p288_p9 = pnand %p287_p8, %p281_p5 }
  0x2f   :  { %291 = shalt.err (!%p288_p9)
}
  0x30   :  { %39 = dma.hbm_to_vmem [thread:$0]  %s372_s2, 128, %s37_s9, [#allocation9]  }
  0x31   :  { %292 = dma.done.wait [#allocation7], 128  }
  0x32   :  { %293 = vsyncadd [#allocation7], 4294967168 }
  0x33   :  { %294 = dma.done.wait [#allocation9], 256  }
  0x34   :  { %295 = vsyncadd [#allocation9], 4294967040  ;;  %v77_v0 = vld [vmem:[#allocation6] sm:$0xff]  ;;  %v56_v1 = vld [vmem:[#allocation10] sm:$0xff]  ;;  %vm53_vm0 = vcmask 7168   ;;  %v299_v6 = vmov 0.0  }
  0x35   :  { %v78_v2 = vmul.f32 %v77_v0, %v77_v0  ;;  %v58_v3 = vmul.f32 %v56_v1, %v56_v1  ;;  %v57_v4 = vld [vmem:[#allocation8] sm:$0xff]  ;;  %55 = vst.msk [vmem:[#allocation4] sm:$0xff] %vm53_vm0, %v299_v6  ;;  %200 = vmatprep.subr.mxu0 %v299_v6  ;;  %vm300_vm1 = vmmov 0   ;;  %v301_v16 = vmov -inf  }
  0x36   :  { %v64_v5 = vmul.f32 %v57_v4, %v57_v4  ;;  %202 = vmatprep.mubr.msk.f32.mxu0 %vm300_vm1, %v299_v6  ;;  %54 = vst.msk [vmem:[#allocation3] sm:$0xff] %vm53_vm0, %v301_v16  ;;  %vm156_vm2 = vcmask 64512   ;;  %v302_v20 = vmov 0  }
  0x37   :  { %79 = vadd.xlane.f32.xlu0 %v78_v2  ;;  %212 = vset.pattern.permute.xlu1 %v302_v20 }
  0x38   :  { %213 = vset.pattern.permute.xlu0 %v302_v20 }
  0x3b   :  { %59 = vadd.xlane.f32.xlu0 %v58_v3 }
  0x3c   :  { %v164_v37 = vld [vmem:[#allocation4] sm:$0xff] }
  0x3d   :  { %v155_v21 = vld [vmem:[#allocation3] sm:$0xff] }
  0x3f   :  { %65 = vadd.xlane.f32.xlu0 %v64_v5 }
  0xc4   :  { %v80_v7 = vpop.xlane.xlu0 %79 }
  0xc5   :  { %v81_v8 = vmax.f32 %v80_v7, 1e-24 }
  0xc7   :  { %214 = vrsqrt.f32 %v81_v8 }
  0xc8   :  { %v60_v9 = vpop.xlane.xlu0 %59 }
  0xc9   :  { %v61_v10 = vmax.f32 %v60_v9, 1e-24 }
  0xcb   :  { %216 = vrsqrt.f32 %v61_v10 }
  0xcc   :  { %v66_v25 = vpop.xlane.xlu0 %65 }
  0xcd   :  { %v67_v26 = vmax.f32 %v66_v25, 1e-24 }
  0xcf   :  { %218 = vrsqrt.f32 %v67_v26 }
  0xd1   :  { %v215_v11 = vpop.eup %214 }
  0xd2   :  { %v83_v12 = vmul.f32 %v215_v11, %v77_v0 }
  0xd4   :  { %201 = vmatpush3.xpose.msra.mxu0 %v83_v12 }
  0xd5   :  { %v217_v13 = vpop.eup %216 }
  0xd6   :  { %v63_v14 = vmul.f32 %v217_v13, %v56_v1 }
  0xd8   :  { %v75_v15 = vmul.f32 2.0, %v63_v14 }
  0xd9   :  { %v219_v30 = vpop.eup %218 }
  0xda   :  { %203 = vmatmul.mubr.f32.vlgmr.msra.gmra.mrb[0].mxu0 %v75_v15  ;;  %v69_v32 = vmul.f32 %v219_v30, %v57_v4 }
  0xdc   :  { %v70_v34 = vmul.f32 %v69_v32, %v63_v14 }
 0x1ad   :  { %v151_v17 = vpop.f32.mrb[0].mxu0 }
 0x1ae   :  { %v204_v18 = vpop.f32.mrb[1].mxu0  ;;  %v157_v19 = vsel %vm156_vm2, %v151_v17, -inf }
 0x1af   :  { %158 = vmax.xlane.f32.xlu1 %v157_v19 }
 0x23c   :  { %v159_v22 = vpop.xlane.xlu1 %158 }
 0x23d   :  { %v160_v23 = vmax.f32 %v155_v21, %v159_v22 }
 0x23f   :  { %v161_v24 = vsub.f32 %v155_v21, %v160_v23  ;;  %180 = vst.msk [vmem:[#allocation3] sm:$0xff] %vm53_vm0, %v160_v23  ;;  %168 = vperm.xlu1 %212, %v160_v23  }
 0x241   :  { %v162_v35 = vmul.f32 1.442695, %v161_v24 }
 0x246   :  { %v184_v46 = vld [vmem:[#allocation3] sm:$0xff] }
 0x2be   :  { %v169_v27 = vpop.permute.xlu1 %168 }
 0x2bf   :  { %v171_v28 = vsub.f32 %v151_v17, %v169_v27 }
 0x2c1   :  { %v172_v29 = vmul.f32 1.442695, %v171_v28 }
 0x2c3   :  { %220 = vpow2.f32 %v172_v29 }
 0x2c4   :  { %222 = vpow2.f32 %v162_v35 }
 0x2cd   :  { %v221_v31 = vpop.eup %220 }
 0x2ce   :  { %v174_v33 = vsel %vm156_vm2, %v221_v31, 0.0  ;;  %v223_v36 = vpop.eup %222 }
 0x2cf   :  { %175 = vadd.xlane.f32.xlu0 %v174_v33  ;;  %v165_v38 = vmul.f32 %v223_v36, %v164_v37 }
 0x2d3   :  { %71 = vadd.xlane.f32.xlu0 %v70_v34 }
 0x35c   :  { %v176_v39 = vpop.xlane.xlu0 %175 }
 0x35d   :  { %v177_v40 = vadd.f32 %v176_v39, %v165_v38 }
 0x35f   :  { %179 = vst.msk [vmem:[#allocation4] sm:$0xff] %vm53_vm0, %v177_v40 }
 0x360   :  { %v72_v41 = vpop.xlane.xlu0 %71 }
 0x361   :  { %v73_v42 = vmul.f32 2.0, %v72_v41 }
 0x363   :  { %74 = vst.msk [vmem:[#allocation5] sm:$0xff] %vm53_vm0, %v73_v42 }
 0x366   :  { %v185_v43 = vld [vmem:[#allocation4] sm:$0xff] }
 0x367   :  { %224 = vlog2.f32 %v185_v43 }
 0x36a   :  { %v189_v48 = vld [vmem:[#allocation5] sm:$0xff] }
 0x371   :  { %v225_v44 = vpop.eup %224 }
 0x372   :  { %v187_v45 = vmul.f32 0.6931472, %v225_v44 }
 0x374   :  { %v188_v47 = vadd.f32 %v187_v45, %v184_v46 }
 0x376   :  { %v190_v49 = vsub.f32 %v188_v47, %v189_v48 }
 0x378   :  { %191 = vst.msk [vmem:[%s373_s3] sm:$0xff] %vm53_vm0, %v190_v49 }
 0x379   :  { %196 = vsyncpa [#allocation7], 1 }
 0x37a   :  { %197 = vsyncpa [#allocation9], 1 }

</bundles_post_ra>
